<compile_context>
chip_gen: v7x
topology: tpu7x:2x2x1
jax: 0.10.0
libtpu: 0.0.40
codegen_flags: <defaults>
</compile_context>

<pallas_src>
import functools
import math

import jax
import jax.numpy as jnp
from jax import lax
from jax.experimental import pallas as pl
from jax.experimental.pallas import tpu as pltpu

# Sized against v7x's 64 MiB physical VMEM (also lifts the 32 MiB scoped default on v5e/v6e).
_VMEM_LIMIT_BYTES = 48 * 1024 * 1024


# ----------------------------------------------------------------------------
# Tiling helpers
# ----------------------------------------------------------------------------
def _pick_chunk(seq_len, preferred):
    c = max(1, min(preferred, seq_len))
    while seq_len % c:
        c -= 1
    return c


def _pick_row_tile(n, target):
    """Largest row tile <= target that divides n and is sublane-friendly."""
    if n <= target:
        return n
    for c in range(min(target, n), 7, -1):
        if n % c == 0 and c % 8 == 0:
            return c
    return n


def _pick_batch_tile(b, target=128):
    if b <= 8:
        return b
    for c in range(min(target, max(8, b // 2)), 7, -1):
        if b % c == 0 and c % 8 == 0:
            return c
    return b


# ----------------------------------------------------------------------------
# 1) Embedding lookup: batched row gather (R rows per grid step, resident table)
# ----------------------------------------------------------------------------
def _embed_gather_kernel(ids_ref, table_ref, out_ref, *, rows):
    base = pl.program_id(0) * rows

    def body(r, carry):
        idx = ids_ref[base + r]          # scalar read from SMEM-prefetched ids
        out_ref[r] = table_ref[idx]      # (1, E) dynamic leading-axis gather
        return carry

    lax.fori_loop(0, rows, body, None, unroll=True)


def embedding_lookup(flat_ids, table, *, rows_per_step=64):
    """flat_ids: (T,) int32 token ids, table: (V, E) f32  ->  (T, E) f32."""
    T = flat_ids.shape[0]
    V, E = table.shape
    rows = _pick_row_tile(T, rows_per_step)
    table3 = table.reshape(V, 1, E)      # leading axis = gather axis, (1, E) row tiles
    kernel = functools.partial(_embed_gather_kernel, rows=rows)
    out = pl.pallas_call(
        kernel,
        out_shape=jax.ShapeDtypeStruct((T, 1, E), table.dtype),
        grid_spec=pltpu.PrefetchScalarGridSpec(
            num_scalar_prefetch=1,
            grid=(T // rows,),
            in_specs=[
                # whole table resident in VMEM (fits easily at demo V*E)
                pl.BlockSpec((V, 1, E), lambda i, ids: (0, 0, 0)),
            ],
            out_specs=pl.BlockSpec((rows, 1, E), lambda i, ids: (i, 0, 0)),
        ),
        compiler_params=pltpu.CompilerParams(dimension_semantics=("parallel",)),
    )(flat_ids.astype(jnp.int32), table3)
    return out.reshape(T, E)


# ----------------------------------------------------------------------------
# 2) Input projections (hoisted out of the recurrence), row-tiled over S*B.
#    Gate order per direction = (i, f, g, o); column layout [fwd 4H | rev 4H].
#    Weights are stored bf16; activations are cast to bf16 at the MXU operand.
# ----------------------------------------------------------------------------
def _proj_single_kernel(x_ref, w_ref, b_ref, out_ref):
    out_ref[...] = (jnp.dot(x_ref[...].astype(jnp.bfloat16), w_ref[...],
                            preferred_element_type=jnp.float32) + b_ref[...])


def input_projection_single(x, w, b, *, row_tile=1024):
    """x: (N, I) f32, w: (I, 8H) bf16, b: (1, 8H) f32 -> (N, 8H) f32."""
    N, I = x.shape
    G = w.shape[1]
    tm = _pick_row_tile(N, row_tile)
    return pl.pallas_call(
        _proj_single_kernel,
        out_shape=jax.ShapeDtypeStruct((N, G), jnp.float32),
        grid=(N // tm,),
        in_specs=[
            pl.BlockSpec((tm, I), lambda i: (i, 0)),
            pl.BlockSpec((I, G), lambda i: (0, 0)),   # resident weight
            pl.BlockSpec((1, G), lambda i: (0, 0)),   # resident fused bias
        ],
        out_specs=pl.BlockSpec((tm, G), lambda i: (i, 0)),
        compiler_params=pltpu.CompilerParams(
            dimension_semantics=("parallel",),
            vmem_limit_bytes=_VMEM_LIMIT_BYTES),
    )(x, w, b)


def _proj_pair_kernel(xa_ref, xb_ref, wa_ref, wb_ref, b_ref, out_ref):
    # Fuses the "concat(out_fwd, out_rev)" of the previous layer into the matmul:
    # [xa | xb] @ W == xa @ W_top + xb @ W_bot  (no (S,B,2H) concat HBM round trip).
    out_ref[...] = (
        jnp.dot(xa_ref[...].astype(jnp.bfloat16), wa_ref[...],
                preferred_element_type=jnp.float32)
        + jnp.dot(xb_ref[...].astype(jnp.bfloat16), wb_ref[...],
                  preferred_element_type=jnp.float32)
        + b_ref[...])


def input_projection_pair(xa, xb, wa, wb, b, *, row_tile=1024):
    """xa/xb: (N, H) f32, wa/wb: (H, 8H) bf16, b: (1, 8H) f32 -> (N, 8H) f32."""
    N, H = xa.shape
    G = wa.shape[1]
    tm = _pick_row_tile(N, row_tile)
    return pl.pallas_call(
        _proj_pair_kernel,
        out_shape=jax.ShapeDtypeStruct((N, G), jnp.float32),
        grid=(N // tm,),
        in_specs=[
            pl.BlockSpec((tm, H), lambda i: (i, 0)),
            pl.BlockSpec((tm, H), lambda i: (i, 0)),
            pl.BlockSpec((H, G), lambda i: (0, 0)),
            pl.BlockSpec((H, G), lambda i: (0, 0)),
            pl.BlockSpec((1, G), lambda i: (0, 0)),
        ],
        out_specs=pl.BlockSpec((tm, G), lambda i: (i, 0)),
        compiler_params=pltpu.CompilerParams(
            dimension_semantics=("parallel",),
            vmem_limit_bytes=_VMEM_LIMIT_BYTES),
    )(xa, xb, wa, wb, b)


# ----------------------------------------------------------------------------
# 3) Fused bidirectional LSTM recurrence.
#    grid = (B // Tb, S // Tc): batch-tile axis is "parallel" (megacore-safe,
#    state scratch is per batch tile and re-initialized at chunk 0), the
#    sequence-chunk axis is "arbitrary" (sequential h/c carry in VMEM scratch).
#    Two small (Tb,H)x(H,4H) bf16 matmuls per step (one per direction); reverse
#    direction time indexing is expressed purely with reversed index_maps.
# ----------------------------------------------------------------------------
def _bilstm_chunk_kernel(xf_ref, xb_ref, whf_ref, whb_ref, outf_ref, outb_ref,
                         hf_scr, hb_scr, cf_scr, cb_scr, *, chunk, hidden):
    H = hidden
    c_idx = pl.program_id(1)

    @pl.when(c_idx == 0)
    def _():
        hf_scr[...] = jnp.zeros_like(hf_scr)
        hb_scr[...] = jnp.zeros_like(hb_scr)
        cf_scr[...] = jnp.zeros_like(cf_scr)
        cb_scr[...] = jnp.zeros_like(cb_scr)

    def _sigmoid(x):
        # sigmoid(x) == 0.5*(tanh(x/2)+1): 1 EUP push instead of exp+reciprocal (2),
        # the +/x move to the underutilized VPU slots.
        return 0.5 * jnp.tanh(0.5 * x) + 0.5

    def _cell(gates, c_prev):
        # gates: (Tb, 4H), torch gate order (i, f, g, o).
        i_g = _sigmoid(gates[:, 0:H])
        f_g = _sigmoid(gates[:, H:2 * H])
        g_g = jnp.tanh(gates[:, 2 * H:3 * H])
        o_g = _sigmoid(gates[:, 3 * H:4 * H])
        c_new = f_g * c_prev + i_g * g_g
        h_new = o_g * jnp.tanh(c_new)
        return c_new, h_new

    def step(lt, carry):
        # One small matmul per direction (no 50%-zero block-diagonal weight).
        hp_f = jnp.dot(hf_scr[...].astype(jnp.bfloat16), whf_ref[...],
                       preferred_element_type=jnp.float32)        # (Tb, 4H)
        hp_b = jnp.dot(hb_scr[...].astype(jnp.bfloat16), whb_ref[...],
                       preferred_element_type=jnp.float32)        # (Tb, 4H)
        g_f = xf_ref[lt] + hp_f                                   # forward gates
        g_b = xb_ref[chunk - 1 - lt] + hp_b                       # reverse gates
        c_f, h_f = _cell(g_f, cf_scr[...])
        c_b, h_b = _cell(g_b, cb_scr[...])
        cf_scr[...] = c_f
        hf_scr[...] = h_f
        cb_scr[...] = c_b
        hb_scr[...] = h_b
        outf_ref[lt] = h_f.astype(outf_ref.dtype)
        outb_ref[chunk - 1 - lt] = h_b.astype(outb_ref.dtype)
        return carry

    lax.fori_loop(0, chunk, step, None, unroll=min(chunk, 8))


def bilstm_layer(xproj, whh_f, whh_b, *, seq_chunk):
    """xproj: (S, B, 8H) f32 precomputed x@W_ih + fused bias for both directions
       ([..., :4H]=fwd contribution at time t, [..., 4H:]=rev contribution at time t).
       whh_f / whh_b: (H, 4H) bf16 recurrent weights (already transposed).
       Returns (out_fwd, out_rev), each (S, B, H) f32 in original time order."""
    S, B, G8 = xproj.shape
    H = G8 // 8
    assert S % seq_chunk == 0
    nc = S // seq_chunk
    tb = _pick_batch_tile(B)
    nb = B // tb

    kernel = functools.partial(_bilstm_chunk_kernel, chunk=seq_chunk, hidden=H)
    out_f, out_b = pl.pallas_call(
        kernel,
        out_shape=(jax.ShapeDtypeStruct((S, B, H), jnp.float32),
                   jax.ShapeDtypeStruct((S, B, H), jnp.float32)),
        grid=(nb, nc),
        in_specs=[
            # forward-direction gate contributions, chunk c in original time order
            pl.BlockSpec((seq_chunk, tb, 4 * H), lambda b, c: (c, b, 0)),
            # reverse-direction gate contributions: time-reversed chunk, gate-half 1
            pl.BlockSpec((seq_chunk, tb, 4 * H), lambda b, c: (nc - 1 - c, b, 1)),
            # recurrent weights, resident across the whole grid (constant index_map)
            pl.BlockSpec((H, 4 * H), lambda b, c: (0, 0)),
            pl.BlockSpec((H, 4 * H), lambda b, c: (0, 0)),
        ],
        out_specs=(
            pl.BlockSpec((seq_chunk, tb, H), lambda b, c: (c, b, 0)),
            pl.BlockSpec((seq_chunk, tb, H), lambda b, c: (nc - 1 - c, b, 0)),
        ),
        scratch_shapes=[
            pltpu.VMEM((tb, H), jnp.float32),   # h forward
            pltpu.VMEM((tb, H), jnp.float32),   # h reverse
            pltpu.VMEM((tb, H), jnp.float32),   # c forward
            pltpu.VMEM((tb, H), jnp.float32),   # c reverse
        ],
        compiler_params=pltpu.CompilerParams(
            dimension_semantics=("parallel", "arbitrary"),
            vmem_limit_bytes=_VMEM_LIMIT_BYTES),
    )(xproj, xproj, whh_f, whh_b)
    return out_f, out_b


# ----------------------------------------------------------------------------
# 4) Decoder linear kernel: out = x @ W^T + b  (tiny, kept f32)
# ----------------------------------------------------------------------------
def _decoder_kernel(x_ref, w_ref, b_ref, out_ref):
    out_ref[...] = (jnp.dot(x_ref[...], w_ref[...],
                            preferred_element_type=jnp.float32) + b_ref[...])


def decoder_linear(x, w_t, b):
    """x: (B, F), w_t: (F, O), b: (1, O) -> (B, O)."""
    B, F = x.shape
    O = w_t.shape[1]
    return pl.pallas_call(
        _decoder_kernel,
        out_shape=jax.ShapeDtypeStruct((B, O), jnp.float32),
    )(x, w_t, b)


# ----------------------------------------------------------------------------
# BiRNN module (parameters + forward), mirroring the PyTorch module semantics.
# ----------------------------------------------------------------------------
class BiRNNPallas:
    def __init__(self, vocab_size, embed_size, num_hiddens, num_layers, key,
                 seq_chunk=32, embed_rows=64, proj_rows=1024):
        self.vocab_size = vocab_size
        self.embed_size = embed_size
        self.num_hiddens = num_hiddens
        self.num_layers = num_layers
        self.seq_chunk = seq_chunk
        self.embed_rows = embed_rows
        self.proj_rows = proj_rows

        H = num_hiddens
        keys = iter(jax.random.split(key, 1 + num_layers * 2 * 4 + 2))

        # nn.Embedding(len(vocab), embed_size)  (gather only -> kept f32)
        self.embedding = 0.1 * jax.random.normal(next(keys),
                                                 (vocab_size, embed_size),
                                                 dtype=jnp.float32)

        # Bidirectional LSTM params, torch layout: W_ih (4H, I), W_hh (4H, H),
        # b_ih (4H,), b_hh (4H,), gate order (i, f, g, o).
        bound = 1.0 / math.sqrt(H)
        u = lambda k, shp: jax.random.uniform(k, shp, jnp.float32, -bound, bound)

        self.raw_layers = []     # torch-layout f32 params, used by the pure-JAX reference
        self.fused_layers = []   # kernel-layout params (bf16 MXU weights, f32 fused bias)
        for layer in range(num_layers):
            in_size = embed_size if layer == 0 else 2 * H
            dirs = []
            for _direction in range(2):   # 0 = forward, 1 = reverse
                w_ih = u(next(keys), (4 * H, in_size))
                w_hh = u(next(keys), (4 * H, H))
                b_ih = u(next(keys), (4 * H,))
                b_hh = u(next(keys), (4 * H,))
                dirs.append((w_ih, w_hh, b_ih + b_hh))
            (wif, whf, bf), (wib, whb, bb) = dirs
            self.raw_layers.append(((wif, whf, bf), (wib, whb, bb)))

            # Fused input-projection weight (I, 8H): columns [0:4H]=fwd, [4H:8H]=rev.
            wih_cat = jnp.concatenate([wif.T, wib.T], axis=1).astype(jnp.bfloat16)
            bias_cat = jnp.concatenate([bf, bb]).reshape(1, 8 * H)       # f32
            if layer == 0:
                wih_parts = (wih_cat,)                       # (E, 8H)
            else:
                wih_parts = (wih_cat[:H], wih_cat[H:])       # rows for fwd / rev inputs
            # Separate per-direction recurrent weights (H, 4H), already transposed.
            whh_f = whf.T.astype(jnp.bfloat16)
            whh_b = whb.T.astype(jnp.bfloat16)
            self.fused_layers.append((wih_parts, whh_f, whh_b, bias_cat))

        # nn.Linear(4 * num_hiddens, 2)
        fan_in = 4 * H
        lbound = 1.0 / math.sqrt(fan_in)
        self.dec_w = jax.random.uniform(next(keys), (2, fan_in), jnp.float32,
                                        -lbound, lbound)
        self.dec_b = jax.random.uniform(next(keys), (2,), jnp.float32,
                                        -lbound, lbound)

    def __call__(self, inputs):
        # inputs: (batch, seq) int32 token ids
        x_ids = inputs.T                               # (seq, batch) == permute(1, 0)
        S, B = x_ids.shape
        H = self.num_hiddens
        chunk = _pick_chunk(S, self.seq_chunk)

        emb = embedding_lookup(x_ids.reshape(-1), self.embedding,
                               rows_per_step=self.embed_rows)           # (S*B, E)

        out_f = out_b = None
        for layer in range(self.num_layers):
            wih_parts, whh_f, whh_b, bias_cat = self.fused_layers[layer]
            if layer == 0:
                xproj = input_projection_single(emb, wih_parts[0], bias_cat,
                                                row_tile=self.proj_rows)
            else:
                xa = out_f.reshape(S * B, H)
                xb = out_b.reshape(S * B, H)
                xproj = input_projection_pair(xa, xb, wih_parts[0], wih_parts[1],
                                              bias_cat, row_tile=self.proj_rows)
            xproj = xproj.reshape(S, B, 8 * H)                          # (S, B, 8H)
            out_f, out_b = bilstm_layer(xproj, whh_f, whh_b, seq_chunk=chunk)

        # encoding = cat(outputs[0], outputs[-1]) = [h_f(0), h_b(0), h_f(S-1), h_b(S-1)]
        encoding = jnp.concatenate(
            [out_f[0], out_b[0], out_f[S - 1], out_b[S - 1]], axis=-1)  # (B, 4H)
        return decoder_linear(encoding, self.dec_w.T, self.dec_b.reshape(1, -1))


# ----------------------------------------------------------------------------
# Pure-JAX f32 reference (sanity check of the Pallas kernels), torch-layout params.
# ----------------------------------------------------------------------------
def _ref_forward(model, inputs):
    H = model.num_hiddens
    x_ids = inputs.T
    S, B = x_ids.shape
    h = jnp.take(model.embedding, x_ids.reshape(-1), axis=0).reshape(
        S, B, model.embed_size)

    def run_dir(xseq, w_ih, w_hh, b):
        def step(carry, x_t):
            hs, cs = carry
            gates = x_t @ w_ih.T + hs @ w_hh.T + b
            i_g = jax.nn.sigmoid(gates[:, 0:H])
            f_g = jax.nn.sigmoid(gates[:, H:2 * H])
            g_g = jnp.tanh(gates[:, 2 * H:3 * H])
            o_g = jax.nn.sigmoid(gates[:, 3 * H:4 * H])
            cs = f_g * cs + i_g * g_g
            hs = o_g * jnp.tanh(cs)
            return (hs, cs), hs

        init = (jnp.zeros((B, H), jnp.float32), jnp.zeros((B, H), jnp.float32))
        _, outs = lax.scan(step, init, xseq)
        return outs

    for (wif, whf, bf), (wib, whb, bb) in model.raw_layers:
        out_f = run_dir(h, wif, whf, bf)
        out_b = jnp.flip(run_dir(jnp.flip(h, axis=0), wib, whb, bb), axis=0)
        h = jnp.concatenate([out_f, out_b], axis=-1)

    encoding = jnp.concatenate([h[0], h[-1]], axis=-1)
    return encoding @ model.dec_w.T + model.dec_b


if __name__ == "__main__":
    # Small, deterministic configuration.
    vocab_size = 50
    embed_size = 32
    num_hiddens = 32
    num_layers = 2
    batch = 2
    seq = 8

    key = jax.random.PRNGKey(0)
    k_param, k_data = jax.random.split(key)

    # seq_chunk=4 -> 2 sequence chunks (exercises cross-chunk state carry and the reversed
    # index maps); embed_rows=8 / proj_rows=8 exercise the batched gather and row tiling.
    model = BiRNNPallas(vocab_size, embed_size, num_hiddens, num_layers, k_param,
                        seq_chunk=4, embed_rows=8, proj_rows=8)

    inputs = jax.random.randint(k_data, (batch, seq), 0, vocab_size,
                                dtype=jnp.int32)   # (batch, seq) token ids

    out = jax.block_until_ready(model(inputs))
    assert out.shape == (batch, 2), out.shape

    ref = jax.block_until_ready(_ref_forward(model, inputs))
    # Tolerance accounts for bf16 MXU operands in the kernels vs the f32 reference.
    assert jnp.allclose(out, ref, atol=2e-2, rtol=2e-2), (out, ref)

    print("KERNEL_OK")
</pallas_src>

<mosaic_0001>
module attributes {stable_mosaic.version = 11 : i64} {
  func.func @_embed_gather_kernel(%arg0: i32, %arg1: memref<16xi32, #tpu.memory_space<smem>>, %arg2: memref<50x1x32xf32, #tpu.memory_space<vmem>>, %arg3: memref<8x1x32xf32, #tpu.memory_space<vmem>>) attributes {dimension_semantics = [#tpu.dimension_semantics<parallel>], iteration_bounds = array<i64: 2>, scalar_prefetch = 1 : i64, scratch_operands = 0 : i64, tpu.core_type = #tpu.core_type<tc>, window_params = [{pipeline_mode = #tpu.pipeline_mode<synchronous>, transform_indices = @transform_0, window_bounds = array<i64: 50, 1, 32>}, {transform_indices = @transform_1, window_bounds = array<i64: 8, 1, 32>}]} {
    %c8_i32 = arith.constant 8 : i32
    %0 = arith.muli %arg0, %c8_i32 : i32
    %c0_i32 = arith.constant 0 : i32
    %1 = arith.addi %0, %c0_i32 : i32
    %2 = arith.index_cast %1 : i32 to index
    %3 = memref.load %arg1[%2] : memref<16xi32, #tpu.memory_space<smem>>
    %4 = arith.index_cast %3 : i32 to index
    %c0 = arith.constant 0 : index
    %c0_0 = arith.constant 0 : index
    %5 = vector.load %arg2[%4, %c0, %c0_0] : memref<50x1x32xf32, #tpu.memory_space<vmem>>, vector<1x1x32xf32>
    %6 = vector.shape_cast %5 : vector<1x1x32xf32> to vector<1x32xf32>
    %7 = arith.index_cast %c0_i32 : i32 to index
    %c0_1 = arith.constant 0 : index
    %c0_2 = arith.constant 0 : index
    %8 = vector.load %arg3[%7, %c0_1, %c0_2] : memref<8x1x32xf32, #tpu.memory_space<vmem>>, vector<1x1x32xf32>
    %9 = vector.shape_cast %8 : vector<1x1x32xf32> to vector<1x32xf32>
    %10 = vector.shape_cast %6 : vector<1x32xf32> to vector<1x1x32xf32>
    tpu.vector_store %arg3[%7, %c0_1, %c0_2], %10 {strides = array<i32>} : memref<8x1x32xf32, #tpu.memory_space<vmem>>, vector<1x1x32xf32>,
    %c1_i32 = arith.constant 1 : i32
    %11 = arith.addi %0, %c1_i32 : i32
    %12 = arith.index_cast %11 : i32 to index
    %13 = memref.load %arg1[%12] : memref<16xi32, #tpu.memory_space<smem>>
    %14 = arith.index_cast %13 : i32 to index
    %c0_3 = arith.constant 0 : index
    %c0_4 = arith.constant 0 : index
    %15 = vector.load %arg2[%14, %c0_3, %c0_4] : memref<50x1x32xf32, #tpu.memory_space<vmem>>, vector<1x1x32xf32>
    %16 = vector.shape_cast %15 : vector<1x1x32xf32> to vector<1x32xf32>
    %17 = arith.index_cast %c1_i32 : i32 to index
    %c0_5 = arith.constant 0 : index
    %c0_6 = arith.constant 0 : index
    %18 = vector.load %arg3[%17, %c0_5, %c0_6] : memref<8x1x32xf32, #tpu.memory_space<vmem>>, vector<1x1x32xf32>
    %19 = vector.shape_cast %18 : vector<1x1x32xf32> to vector<1x32xf32>
    %20 = vector.shape_cast %16 : vector<1x32xf32> to vector<1x1x32xf32>
    tpu.vector_store %arg3[%17, %c0_5, %c0_6], %20 {strides = array<i32>} : memref<8x1x32xf32, #tpu.memory_space<vmem>>, vector<1x1x32xf32>,
    %c2_i32 = arith.constant 2 : i32
    %21 = arith.addi %0, %c2_i32 : i32
    %22 = arith.index_cast %21 : i32 to index
    %23 = memref.load %arg1[%22] : memref<16xi32, #tpu.memory_space<smem>>
    %24 = arith.index_cast %23 : i32 to index
    %c0_7 = arith.constant 0 : index
    %c0_8 = arith.constant 0 : index
    %25 = vector.load %arg2[%24, %c0_7, %c0_8] : memref<50x1x32xf32, #tpu.memory_space<vmem>>, vector<1x1x32xf32>
    %26 = vector.shape_cast %25 : vector<1x1x32xf32> to vector<1x32xf32>
    %27 = arith.index_cast %c2_i32 : i32 to index
    %c0_9 = arith.constant 0 : index
    %c0_10 = arith.constant 0 : index
    %28 = vector.load %arg3[%27, %c0_9, %c0_10] : memref<8x1x32xf32, #tpu.memory_space<vmem>>, vector<1x1x32xf32>
    %29 = vector.shape_cast %28 : vector<1x1x32xf32> to vector<1x32xf32>
    %30 = vector.shape_cast %26 : vector<1x32xf32> to vector<1x1x32xf32>
    tpu.vector_store %arg3[%27, %c0_9, %c0_10], %30 {strides = array<i32>} : memref<8x1x32xf32, #tpu.memory_space<vmem>>, vector<1x1x32xf32>,
    %c3_i32 = arith.constant 3 : i32
    %31 = arith.addi %0, %c3_i32 : i32
    %32 = arith.index_cast %31 : i32 to index
    %33 = memref.load %arg1[%32] : memref<16xi32, #tpu.memory_space<smem>>
    %34 = arith.index_cast %33 : i32 to index
    %c0_11 = arith.constant 0 : index
    %c0_12 = arith.constant 0 : index
    %35 = vector.load %arg2[%34, %c0_11, %c0_12] : memref<50x1x32xf32, #tpu.memory_space<vmem>>, vector<1x1x32xf32>
    %36 = vector.shape_cast %35 : vector<1x1x32xf32> to vector<1x32xf32>
    %37 = arith.index_cast %c3_i32 : i32 to index
    %c0_13 = arith.constant 0 : index
    %c0_14 = arith.constant 0 : index
    %38 = vector.load %arg3[%37, %c0_13, %c0_14] : memref<8x1x32xf32, #tpu.memory_space<vmem>>, vector<1x1x32xf32>
    %39 = vector.shape_cast %38 : vector<1x1x32xf32> to vector<1x32xf32>
    %40 = vector.shape_cast %36 : vector<1x32xf32> to vector<1x1x32xf32>
    tpu.vector_store %arg3[%37, %c0_13, %c0_14], %40 {strides = array<i32>} : memref<8x1x32xf32, #tpu.memory_space<vmem>>, vector<1x1x32xf32>,
    %c4_i32 = arith.constant 4 : i32
    %41 = arith.addi %0, %c4_i32 : i32
    %42 = arith.index_cast %41 : i32 to index
    %43 = memref.load %arg1[%42] : memref<16xi32, #tpu.memory_space<smem>>
    %44 = arith.index_cast %43 : i32 to index
    %c0_15 = arith.constant 0 : index
    %c0_16 = arith.constant 0 : index
    %45 = vector.load %arg2[%44, %c0_15, %c0_16] : memref<50x1x32xf32, #tpu.memory_space<vmem>>, vector<1x1x32xf32>
    %46 = vector.shape_cast %45 : vector<1x1x32xf32> to vector<1x32xf32>
    %47 = arith.index_cast %c4_i32 : i32 to index
    %c0_17 = arith.constant 0 : index
    %c0_18 = arith.constant 0 : index
    %48 = vector.load %arg3[%47, %c0_17, %c0_18] : memref<8x1x32xf32, #tpu.memory_space<vmem>>, vector<1x1x32xf32>
    %49 = vector.shape_cast %48 : vector<1x1x32xf32> to vector<1x32xf32>
    %50 = vector.shape_cast %46 : vector<1x32xf32> to vector<1x1x32xf32>
    tpu.vector_store %arg3[%47, %c0_17, %c0_18], %50 {strides = array<i32>} : memref<8x1x32xf32, #tpu.memory_space<vmem>>, vector<1x1x32xf32>,
    %c5_i32 = arith.constant 5 : i32
    %51 = arith.addi %0, %c5_i32 : i32
    %52 = arith.index_cast %51 : i32 to index
    %53 = memref.load %arg1[%52] : memref<16xi32, #tpu.memory_space<smem>>
    %54 = arith.index_cast %53 : i32 to index
    %c0_19 = arith.constant 0 : index
    %c0_20 = arith.constant 0 : index
    %55 = vector.load %arg2[%54, %c0_19, %c0_20] : memref<50x1x32xf32, #tpu.memory_space<vmem>>, vector<1x1x32xf32>
    %56 = vector.shape_cast %55 : vector<1x1x32xf32> to vector<1x32xf32>
    %57 = arith.index_cast %c5_i32 : i32 to index
    %c0_21 = arith.constant 0 : index
    %c0_22 = arith.constant 0 : index
    %58 = vector.load %arg3[%57, %c0_21, %c0_22] : memref<8x1x32xf32, #tpu.memory_space<vmem>>, vector<1x1x32xf32>
    %59 = vector.shape_cast %58 : vector<1x1x32xf32> to vector<1x32xf32>
    %60 = vector.shape_cast %56 : vector<1x32xf32> to vector<1x1x32xf32>
    tpu.vector_store %arg3[%57, %c0_21, %c0_22], %60 {strides = array<i32>} : memref<8x1x32xf32, #tpu.memory_space<vmem>>, vector<1x1x32xf32>,
    %c6_i32 = arith.constant 6 : i32
    %61 = arith.addi %0, %c6_i32 : i32
    %62 = arith.index_cast %61 : i32 to index
    %63 = memref.load %arg1[%62] : memref<16xi32, #tpu.memory_space<smem>>
    %64 = arith.index_cast %63 : i32 to index
    %c0_23 = arith.constant 0 : index
    %c0_24 = arith.constant 0 : index
    %65 = vector.load %arg2[%64, %c0_23, %c0_24] : memref<50x1x32xf32, #tpu.memory_space<vmem>>, vector<1x1x32xf32>
    %66 = vector.shape_cast %65 : vector<1x1x32xf32> to vector<1x32xf32>
    %67 = arith.index_cast %c6_i32 : i32 to index
    %c0_25 = arith.constant 0 : index
    %c0_26 = arith.constant 0 : index
    %68 = vector.load %arg3[%67, %c0_25, %c0_26] : memref<8x1x32xf32, #tpu.memory_space<vmem>>, vector<1x1x32xf32>
    %69 = vector.shape_cast %68 : vector<1x1x32xf32> to vector<1x32xf32>
    %70 = vector.shape_cast %66 : vector<1x32xf32> to vector<1x1x32xf32>
    tpu.vector_store %arg3[%67, %c0_25, %c0_26], %70 {strides = array<i32>} : memref<8x1x32xf32, #tpu.memory_space<vmem>>, vector<1x1x32xf32>,
    %c7_i32 = arith.constant 7 : i32
    %71 = arith.addi %0, %c7_i32 : i32
    %72 = arith.index_cast %71 : i32 to index
    %73 = memref.load %arg1[%72] : memref<16xi32, #tpu.memory_space<smem>>
    %74 = arith.index_cast %73 : i32 to index
    %c0_27 = arith.constant 0 : index
    %c0_28 = arith.constant 0 : index
    %75 = vector.load %arg2[%74, %c0_27, %c0_28] : memref<50x1x32xf32, #tpu.memory_space<vmem>>, vector<1x1x32xf32>
    %76 = vector.shape_cast %75 : vector<1x1x32xf32> to vector<1x32xf32>
    %77 = arith.index_cast %c7_i32 : i32 to index
    %c0_29 = arith.constant 0 : index
    %c0_30 = arith.constant 0 : index
    %78 = vector.load %arg3[%77, %c0_29, %c0_30] : memref<8x1x32xf32, #tpu.memory_space<vmem>>, vector<1x1x32xf32>
    %79 = vector.shape_cast %78 : vector<1x1x32xf32> to vector<1x32xf32>
    %80 = vector.shape_cast %76 : vector<1x32xf32> to vector<1x1x32xf32>
    tpu.vector_store %arg3[%77, %c0_29, %c0_30], %80 {strides = array<i32>} : memref<8x1x32xf32, #tpu.memory_space<vmem>>, vector<1x1x32xf32>,
    %c8_i32_31 = arith.constant 8 : i32
    return
  }
  func.func @transform_0(%arg0: i32, %arg1: memref<16xi32, #tpu.memory_space<smem>>) -> (i32, i32, i32) {
    %c0_i32 = arith.constant 0 : i32
    %c0_i32_0 = arith.constant 0 : i32
    %c0_i32_1 = arith.constant 0 : i32
    %c0_i32_2 = arith.constant 0 : i32
    return %c0_i32, %c0_i32_0, %c0_i32_1 : i32, i32, i32
  }
  func.func @transform_1(%arg0: i32, %arg1: memref<16xi32, #tpu.memory_space<smem>>) -> (i32, i32, i32) {
    %c0_i32 = arith.constant 0 : i32
    %c0_i32_0 = arith.constant 0 : i32
    %c0_i32_1 = arith.constant 0 : i32
    return %arg0, %c0_i32, %c0_i32_0 : i32, i32, i32
  }
}

</mosaic_0001>

<bundles_post_ra>
// kernel: tpu_custom_call.1
= control target key start
LH: loop header
LB: loop body
LE: loop exit
PB: predicated region body
PF: predicated region fallthrough
CT: control target
= control target key end

     0   :  { %s529_s0 = inlined_call_operand.vmem [shape: s32[16], index: 0, kind: input, shape index: {}]   ;;  %s530_s1 = inlined_call_operand.vmem [shape: f32[50,1,32], index: 1, kind: input, shape index: {}]   ;;  %s531_s2 = inlined_call_operand.hbm [shape: f32[16,1,32], index: 2, kind: output, shape index: {}]  }
   0x1   :  { %s7_s11 = sshll.u32 %s529_s0, 4  ;;  %s8_s11 = int_to_ptr.vmem [resolvable:$true] %s7_s11 }
   0x2   :  { %s283_s12 = scalar_lea.vmem %s8_s11, 16  ;;  %p288_p1 = scmp.lt.s32.totalorder %s8_s11, %s8_s11 }
   0x3   :  { %p284_p0 = scmp.ne.s32.totalorder %s8_s11, %s283_s12  ;;  %p289_p2 = scmp.lt.s32.totalorder %s283_s12, %s283_s12 }
   0x5   :  { %p290_p3 = por %p289_p2, %p288_p1 }
   0x7   :  { %p291_p4 = pnand %p290_p3, %p284_p0 }
   0x9   :  { %294 = shalt.err (!%p291_p4)  }
   0xa   :  { %s361_s13 = smov [#allocation3]  }
   0xb   :  { %10 = dma.vmem_to_smem %s8_s11, 16, %s361_s13, [#allocation2] }
   0xc   :  { %339 = dma.done.wait [#allocation2], 16 }
   0xd   :  { %340 = vsyncadd [#allocation2], 4294967280 }
   0xe   :  { %12 = sfence }
   0xf   :  { %13 = vsyncpa [#allocation5], 0 }
  0x10   :  { %15 = vsyncpa [#allocation5 + $0x1], 0  ;;  %s383_s14 = smov 0   ;;  %s385_s15 = smov 0  }
  0x11   :  { %s387_s0 = smov 0   ;;  %s389_s16 = smov 0  }
  0x12 LB: > { %s404_s17 = sadd.s32 4294967295, %s359_s16   ;;  %s223_s18 = sadd.s32 4294967294, %s359_s16   ;;  %s359_s16 = sphi %s389_s16, %s537_s16   ;;  %s355_s0 = sphi %s387_s0, %s536_s0   ;;  %s351_s15 = sphi %s385_s15, %s535_s15   ;;  %s347_s14 = sphi %s383_s14, %s534_s14  }
  0x13   : > { %s408_s19 = sadd.s32 1, %s359_s16   ;;  %s49_s20 = sadd.s32 1, %s355_s0 }
  0x14   : > { %s46_s21 = ssub.s32 %s359_s16, %s408_s19  ;;  %p59_p5 = scmp.ne.s32.totalorder %s355_s0, %s351_s15 }
  0x15   : > { %p47_p6 = scmp.eq.s32.totalorder %s46_s21, 0  ;;  %p60_p7 = scmp.eq.s32.totalorder %s404_s17, 1 }
  0x16   : > { %p65_p8 = scmp.ne.s32.totalorder %s351_s15, %s347_s14  ;;  %p66_p9 = scmp.eq.s32.totalorder %s223_s18, 1 }
  0x17   : > { %s419_s22 = scalar_select %p47_p6, %s355_s0, %s49_s20  }
  0x18   : > { %p421_p10 = por %p60_p7, %p59_p5  ;;  %p425_p11 = por %p66_p9, %p65_p8 }
  0x19   : > { %p225_p12 = scmp.ge.s32.totalorder %s359_s16, 1  ;;  %p87_p13 = scmp.lt.s32.totalorder %s359_s16, 3 }
  0x1b   : > { %p88_p0 = pnand %p225_p12, %p87_p13 }
  0x1c   : > { %s99_s25 = sand.u32 (!%p88_p0), 1, %s351_s15   ;;  %s227_s26 = sshll.u32 (!%p88_p0), %s404_s17, 3  ;;  %vm107_vm0 = vcmask (!%p88_p0), 253952  }
  0x1d   : > { %91 = sbr.rel (%p88_p0) target bundleno = 67 (0x43), region = 24  ;;  %s226_s27 = sshll.u32 (!%p88_p0), %s99_s25, 3 }
  0x1e   : > { %s104_s28 = sld [smem:[#allocation3 + %s227_s26]] (!%p88_p0)  ;;  %s109_s29 = sadd.s32 (!%p88_p0), 1, %s227_s26 }
  0x1f   : > { %s110_s30 = sld [smem:[#allocation3 + %s109_s29]] (!%p88_p0)  ;;  %s115_s3 = sadd.s32 (!%p88_p0), 2, %s227_s26 }
  0x20   : > { %s121_s4 = sadd.s32 (!%p88_p0), 3, %s227_s26  ;;  %s116_s5 = sld [smem:[#allocation3 + %s115_s3]] (!%p88_p0) }
  0x21   : > { %s122_s6 = sld [smem:[#allocation3 + %s121_s4]] (!%p88_p0)  ;;  %s127_s10 = sadd.s32 (!%p88_p0), 4, %s227_s26 }
  0x22   : > { %s128_s11 = sld [smem:[#allocation3 + %s127_s10]] (!%p88_p0)  ;;  %s133_s12 = sadd.s32 (!%p88_p0), 5, %s227_s26 }
  0x23   : > { %s438_s13 = scalar_lea.vmem (!%p88_p0), [#allocation4], %s226_s27  ;;  %s134_s18 = sld [smem:[#allocation3 + %s133_s12]] (!%p88_p0) }
  0x24   : > { %s105_s9 = scalar_lea.vmem %s530_s1, %s104_s28  ;;  %s139_s20 = sadd.s32 6, %s227_s26 }
  0x25   : > { %v106_v0 = vld [vmem:[%s105_s9] sm:$0x1]  ;;  %s111_s3 = scalar_lea.vmem %s530_s1, %s110_s30  ;;  %s140_s28 = sld [smem:[#allocation3 + %s139_s20]] }
  0x26   : > { %108 = vst.msk [vmem:[%s438_s13] sm:$0x1] %vm107_vm0, %v106_v0  ;;  %v112_v1 = vld [vmem:[%s111_s3] sm:$0x1]  ;;  %s145_s4 = sadd.s32 7, %s227_s26  ;;  %s117_s8 = scalar_lea.vmem %s530_s1, %s116_s5 }
  0x27   : > { %228 = vst.msk [vmem:[%s438_s13 + $0x1] sm:$0x1] %vm107_vm0, %v112_v1  ;;  %s123_s12 = scalar_lea.vmem %s530_s1, %s122_s6  ;;  %v118_v2 = vld [vmem:[%s117_s8] sm:$0x1]  ;;  %s146_s30 = sld [smem:[#allocation3 + %s145_s4]] }
  0x28   : > { %v124_v3 = vld [vmem:[%s123_s12] sm:$0x1]  ;;  %s165_s21 = sshll.u32 %s438_s13, 4  ;;  %229 = vst.msk [vmem:[%s438_s13 + $0x2] sm:$0x1] %vm107_vm0, %v118_v2  ;;  %s129_s5 = scalar_lea.vmem %s530_s1, %s128_s11  ;;  %s470_s21 = int_to_ptr.vmem [resolvable:$true] %s165_s21 }
  0x29   : > { %230 = vst.msk [vmem:[%s438_s13 + $0x3] sm:$0x1] %vm107_vm0, %v124_v3  ;;  %v130_v4 = vld [vmem:[%s129_s5] sm:$0x1]  ;;  %s135_s6 = scalar_lea.vmem %s530_s1, %s134_s18  ;;  %s240_s27 = sshll.u32 %s404_s17, 7 }
  0x2a   : > { %231 = vst.msk [vmem:[%s438_s13 + $0x4] sm:$0x1] %vm107_vm0, %v130_v4  ;;  %v136_v5 = vld [vmem:[%s135_s6] sm:$0x1]  ;;  %s479_s17 = scalar_lea.hbm %s531_s2, %s240_s27  ;;  %s295_s26 = scalar_lea.vmem %s470_s21, 128 }
  0x2b   : > { %s141_s8 = scalar_lea.vmem %s530_s1, %s140_s28  ;;  %232 = vst.msk [vmem:[%s438_s13 + $0x5] sm:$0x1] %vm107_vm0, %v136_v5  ;;  %s488_s28 = scalar_lea.sflag [#allocation5], %s99_s25 }
  0x2c   : > { %v142_v6 = vld [vmem:[%s141_s8] sm:$0x1]  ;;  %p296_p1 = scmp.ne.s32.totalorder %s470_s21, %s295_s26  ;;  %s362_s20 = smov [#allocation4]  }
  0x2d   : > { %233 = vst.msk [vmem:[%s438_s13 + $0x6] sm:$0x1] %vm107_vm0, %v142_v6  ;;  %s147_s12 = scalar_lea.vmem %s530_s1, %s146_s30  ;;  %s299_s5 = sshll.u32 %s362_s20, 4  ;;  %s300_s5 = int_to_ptr.vmem [resolvable:$false] %s299_s5 }
  0x2e   : > { %v148_v7 = vld [vmem:[%s147_s12] sm:$0x1]  ;;  %p297_p2 = pnand %p296_p1, %p421_p10  ;;  %s301_s29 = scalar_lea.vmem %s300_s5, 256 }
  0x2f   : > { %234 = vst.msk [vmem:[%s438_s13 + $0x7] sm:$0x1] %vm107_vm0, %v148_v7  ;;  %p302_p4 = scmp.lt.s32.totalorder %s470_s21, %s300_s5  ;;  %p303_p5 = scmp.lt.s32.totalorder %s301_s29, %s295_s26 }
  0x30   : > { %p298_p3 = pneg %p297_p2 }
  0x31   : > { %p304_p6 = por %p303_p5, %p302_p4 }
  0x33   : > { %p305_p7 = pnand %p304_p6, %p298_p3 }
  0x35   : > { %308 = shalt.err (!%p305_p7)
}
  0x36   : > { %s309_s25 = scalar_lea.hbm %s479_s17, 128  ;;  %s313_s3 = scalar_lea.hbm %s531_s2, 256 }
  0x37   : > { %p310_p8 = scmp.ne.s32.totalorder %s479_s17, %s309_s25  ;;  %p314_p13 = scmp.lt.u32.totalorder %s479_s17, %s531_s2 }
  0x38   : > { %p315_p0 = scmp.lt.u32.totalorder %s313_s3, %s309_s25  ;;  %p317_p2 = scmp.lt.u32.totalorder %s309_s25, %s479_s17 }
  0x39   : > { %p311_p9 = pnand %p310_p8, %p421_p10 }
  0x3a   : > { %p316_p1 = por %p315_p0, %p314_p13 }
  0x3b   : > { %p312_p12 = pneg %p311_p9 }
  0x3c   : > { %p318_p3 = por %p317_p2, %p316_p1 }
  0x3e   : > { %p319_p4 = pnand %p318_p3, %p312_p12 }
  0x40   : > { %322 = shalt.err (!%p319_p4)
}
  0x41   : > { %s363_s4 = smov 16   ;;  %s364_s7 = smov 1  }
  0x42   : > { %241 = dma.vmem_to_hbm [thread:$0]  (%p421_p10), %s470_s21, 128, %s479_s17, %s488_s28, %s363_s4, %s363_s4, %s364_s7  }
  0x43 PF: > { %p247_p5 = scmp.ge.s32.totalorder %s359_s16, 2  ;;  %s180_s8 = sand.u32 1, %s347_s14  }
  0x44   : > { %s181_s11 = scalar_lea.sflag [#allocation5], %s180_s8 }
  0x45   : > { %p244_p6 = pnand %p247_p5, %p425_p11 }
  0x47   : > { %342 = dma.done.wait (!%p244_p6), %s181_s11, 128  }
  0x48   : > { %344 = vsyncadd (!%p244_p6), %s181_s11, 4294967168  ;;  %p18_p7 = scmp.ge.s32.totalorder %s408_s19, 4   ;;  %s534_s14 = smov %s351_s15 }
  0x49   : > { %s535_s15 = smov %s355_s0  ;;  %s536_s0 = smov %s419_s22 }
  0x4a   : > { %s537_s16 = smov %s408_s19  ;;  %20 = sbr.rel (!%p18_p7) target bundleno = 18 (0x12), region = 71 }
  0x51   :  { %186 = vsyncpa [#allocation5], 1 }
  0x52   :  { %188 = vsyncpa [#allocation5 + $0x1], 1 }

</bundles_post_ra>
